<compile_context>
chip_gen: v7x
topology: tpu7x:2x2x1
jax: 0.10.0
libtpu: 0.0.40
codegen_flags: <defaults>
</compile_context>

<pallas_src>
import jax
import jax.numpy as jnp
from jax.experimental import pallas as pl
from jax.experimental.pallas import tpu as pltpu

LANE = 128


def _round_up(v, m):
    return (v + m - 1) // m * m


def _sublane_granule(dtype):
    itemsize = jnp.dtype(dtype).itemsize
    return max(8, 32 // max(itemsize, 1))


# ---------------------------------------------------------------------------
# Kernels
# ---------------------------------------------------------------------------
def _linear_kernel_acc(x_ref, w_ref, b_ref, o_ref, acc_ref):
    """(i, j, k) grid step of o = x @ w + b with an f32 VMEM accumulator.

    x_ref  : (tm, tk)  activation tile
    w_ref  : (tk, tn)  weight tile, pre-transposed to (K, N) layout
    b_ref  : (1, tn)   bias tile (j-indexed)
    o_ref  : (tm, tn)  output tile
    acc_ref: (tm, tn)  f32 accumulator, resident across the k axis
    """
    k = pl.program_id(2)

    @pl.when(k == 0)
    def _():
        acc_ref[...] = jnp.zeros_like(acc_ref)

    acc_ref[...] += jnp.dot(x_ref[...], w_ref[...],
                            preferred_element_type=jnp.float32)

    @pl.when(k == pl.num_programs(2) - 1)
    def _():
        o_ref[...] = (acc_ref[...] + b_ref[...].astype(jnp.float32)
                      ).astype(o_ref.dtype)


def _linear_kernel_single_k(x_ref, w_ref, b_ref, o_ref):
    """(i, j) grid step when the whole K axis fits in one tile: no scratch."""
    acc = jnp.dot(x_ref[...], w_ref[...], preferred_element_type=jnp.float32)
    o_ref[...] = (acc + b_ref[...].astype(jnp.float32)).astype(o_ref.dtype)


# ---------------------------------------------------------------------------
# One-time parameter layout prep (out of the per-forward hot path)
# ---------------------------------------------------------------------------
def prepare_linear_params(weight, bias, *, tn=512, tk=512):
    """weight: (N, K) PyTorch layout; bias: (N,).

    Returns (wt, b2d, tn, tk) with wt = weight.T zero-padded to (Kp, Np) tile
    multiples and b2d of shape (1, Np).  Transposing + padding the constant
    weight once here removes per-k-step transposes and per-call pad traffic.
    """
    N, K = weight.shape
    tn = min(tn, _round_up(N, LANE))
    tk = min(tk, _round_up(K, LANE))
    Np, Kp = _round_up(N, tn), _round_up(K, tk)
    wt = weight.T
    if Np != N or Kp != K:
        wt = jnp.pad(wt, ((0, Kp - K), (0, Np - N)))
    b2d = (bias if Np == N else jnp.pad(bias, (0, Np - N))).reshape(1, Np)
    return wt, b2d, tn, tk


# ---------------------------------------------------------------------------
# Forward
# ---------------------------------------------------------------------------
def linear_forward(x2d, wt, b2d, n_out, *, tm=512, tn=512, tk=512):
    """x2d: (M, K); wt: (Kp, Np) pre-transposed/padded weight; b2d: (1, Np).
    Returns (M, n_out) = x2d @ weight.T + bias."""
    M, K = x2d.shape
    Kp, Np = wt.shape

    sub = _sublane_granule(x2d.dtype)
    tm = min(tm, _round_up(M, sub))
    Mp = _round_up(M, tm)

    # v7x megacore: make sure both TensorCores get at least one (i, j) tile.
    if (Mp // tm) * (Np // tn) == 1:
        if tn % (2 * LANE) == 0:
            tn //= 2                      # still divides Np, stays 128-aligned
        elif tm % (2 * sub) == 0:
            tm //= 2
            Mp = _round_up(M, tm)

    # Pad only the activation (weight/bias were padded once at init).  Zero
    # K-padding is mathematically neutral; padded M rows are sliced off below.
    xp = x2d if (Mp == M and Kp == K) else jnp.pad(
        x2d, ((0, Mp - M), (0, Kp - K)))

    gi, gj, gk = Mp // tm, Np // tn, Kp // tk
    itemsize = jnp.dtype(x2d.dtype).itemsize

    cost = pl.CostEstimate(
        flops=2 * Mp * Np * Kp,
        transcendentals=0,
        bytes_accessed=(Mp * Kp + Kp * Np + Np + Mp * Np) * itemsize,
    )

    # Double-buffered inputs/outputs + f32 accumulator, with headroom.
    vmem_bytes = 2 * (tm * tk + tk * tn + tn + tm * tn) * itemsize + tm * tn * 4
    vmem_limit = min(max(int(vmem_bytes * 1.5) + (2 << 20), 32 << 20), 64 << 20)

    if gk == 1:
        out = pl.pallas_call(
            _linear_kernel_single_k,
            out_shape=jax.ShapeDtypeStruct((Mp, Np), x2d.dtype),
            grid=(gi, gj),
            in_specs=[
                pl.BlockSpec((tm, tk), lambda i, j: (i, 0)),   # x tile
                pl.BlockSpec((tk, tn), lambda i, j: (0, j)),   # weight (K, N)
                pl.BlockSpec((1, tn), lambda i, j: (0, j)),    # bias
            ],
            out_specs=pl.BlockSpec((tm, tn), lambda i, j: (i, j)),
            compiler_params=pltpu.CompilerParams(
                dimension_semantics=("parallel", "parallel"),
                vmem_limit_bytes=vmem_limit,
            ),
            cost_estimate=cost,
        )(xp, wt, b2d)
    else:
        out = pl.pallas_call(
            _linear_kernel_acc,
            out_shape=jax.ShapeDtypeStruct((Mp, Np), x2d.dtype),
            grid=(gi, gj, gk),
            in_specs=[
                pl.BlockSpec((tm, tk), lambda i, j, k: (i, k)),   # x tile
                pl.BlockSpec((tk, tn), lambda i, j, k: (k, j)),   # weight (K, N)
                pl.BlockSpec((1, tn), lambda i, j, k: (0, j)),    # bias (epilogue)
            ],
            out_specs=pl.BlockSpec((tm, tn), lambda i, j, k: (i, j)),
            scratch_shapes=[pltpu.VMEM((tm, tn), jnp.float32)],
            compiler_params=pltpu.CompilerParams(
                dimension_semantics=("parallel", "parallel", "arbitrary"),
                vmem_limit_bytes=vmem_limit,
            ),
            cost_estimate=cost,
        )(xp, wt, b2d)

    return out[:M, :n_out] if (Mp != M or Np != n_out) else out


def make_text_encoder(weight, bias, *, tm=512, tn=512, tk=512):
    """Returns forward(x) equivalent to TextEncoder.forward (nn.Linear over the
    last axis, arbitrary leading batch dims)."""
    n_out = weight.shape[0]
    wt, b2d, tn, tk = prepare_linear_params(weight, bias, tn=tn, tk=tk)

    def forward(x):
        *lead, K = x.shape
        x2d = x.reshape(-1, K)
        out2d = linear_forward(x2d, wt, b2d, n_out, tm=tm, tn=tn, tk=tk)
        return out2d.reshape(*lead, n_out)

    return forward


if __name__ == "__main__":
    # Small shapes consistent with a text encoder: (batch, seq, input_size)
    batch, seq, input_size, hidden_size = 2, 8, 32, 32

    key = jax.random.PRNGKey(0)
    kx, kw, kb = jax.random.split(key, 3)

    x = jax.random.normal(kx, (batch, seq, input_size), dtype=jnp.float32)
    # Deterministic params mimicking nn.Linear's uniform(-1/sqrt(in), 1/sqrt(in))
    bound = 1.0 / (input_size ** 0.5)
    weight = jax.random.uniform(kw, (hidden_size, input_size), jnp.float32,
                                -bound, bound)
    bias = jax.random.uniform(kb, (hidden_size,), jnp.float32, -bound, bound)

    forward = make_text_encoder(weight, bias)
    out = jax.block_until_ready(forward(x))

    # Correctness check against plain-JAX reference of x @ W^T + b
    ref = jnp.einsum("bsi,hi->bsh", x, weight) + bias
    assert out.shape == (batch, seq, hidden_size)
    assert jnp.allclose(out, ref, atol=1e-5, rtol=1e-5)

    print("KERNEL_OK")
</pallas_src>

<mosaic_0001>
module attributes {stable_mosaic.version = 11 : i64} {
  func.func @_linear_kernel_single_k(%arg0: i32, %arg1: i32, %arg2: memref<8x128xf32, #tpu.memory_space<vmem>>, %arg3: memref<128x128xf32, #tpu.memory_space<vmem>>, %arg4: memref<1x128xf32, #tpu.memory_space<vmem>>, %arg5: memref<8x128xf32, #tpu.memory_space<vmem>>) attributes {dimension_semantics = [#tpu.dimension_semantics<parallel>, #tpu.dimension_semantics<parallel>], iteration_bounds = array<i64: 2, 1>, scalar_prefetch = 0 : i64, scratch_operands = 0 : i64, tpu.core_type = #tpu.core_type<tc>, window_params = [{transform_indices = @transform_0, window_bounds = array<i64: 8, 128>}, {transform_indices = @transform_1, window_bounds = array<i64: 128, 128>}, {transform_indices = @transform_2, window_bounds = array<i64: 1, 128>}, {transform_indices = @transform_3, window_bounds = array<i64: 8, 128>}]} {
    %c0 = arith.constant 0 : index
    %c0_0 = arith.constant 0 : index
    %0 = vector.load %arg2[%c0, %c0_0] : memref<8x128xf32, #tpu.memory_space<vmem>>, vector<8x128xf32>
    %c0_1 = arith.constant 0 : index
    %c0_2 = arith.constant 0 : index
    %1 = vector.load %arg3[%c0_1, %c0_2] : memref<128x128xf32, #tpu.memory_space<vmem>>, vector<128x128xf32>
    %cst = arith.constant dense<0.000000e+00> : vector<8x128xf32>
    %2 = tpu.matmul %0, %1, %cst {dimension_numbers = #tpu.dot_dimension_numbers<[1], [0], [0], [1], [0, 0, 1, 1], [], []>} : vector<8x128xf32>, vector<128x128xf32>, vector<8x128xf32> -> vector<8x128xf32>
    %c0_3 = arith.constant 0 : index
    %c0_4 = arith.constant 0 : index
    %3 = vector.load %arg4[%c0_3, %c0_4] : memref<1x128xf32, #tpu.memory_space<vmem>>, vector<1x128xf32>
    %4 = vector.broadcast %3 : vector<1x128xf32> to vector<8x128xf32>
    %5 = arith.addf %2, %4 : vector<8x128xf32>
    %c0_5 = arith.constant 0 : index
    %c0_6 = arith.constant 0 : index
    %6 = vector.load %arg5[%c0_5, %c0_6] : memref<8x128xf32, #tpu.memory_space<vmem>>, vector<8x128xf32>
    tpu.vector_store %arg5[%c0_5, %c0_6], %5 {strides = array<i32>} : memref<8x128xf32, #tpu.memory_space<vmem>>, vector<8x128xf32>,
    return
  }
  func.func @transform_0(%arg0: i32, %arg1: i32) -> (i32, i32) {
    %c0_i32 = arith.constant 0 : i32
    %c0_i32_0 = arith.constant 0 : i32
    return %arg0, %c0_i32 : i32, i32
  }
  func.func @transform_1(%arg0: i32, %arg1: i32) -> (i32, i32) {
    %c0_i32 = arith.constant 0 : i32
    %c0_i32_0 = arith.constant 0 : i32
    return %c0_i32, %arg1 : i32, i32
  }
  func.func @transform_2(%arg0: i32, %arg1: i32) -> (i32, i32) {
    %c0_i32 = arith.constant 0 : i32
    %c0_i32_0 = arith.constant 0 : i32
    return %c0_i32, %arg1 : i32, i32
  }
  func.func @transform_3(%arg0: i32, %arg1: i32) -> (i32, i32) {
    %c0_i32 = arith.constant 0 : i32
    return %arg0, %arg1 : i32, i32
  }
}

</mosaic_0001>

<bundles_post_ra>
// kernel: tpu_custom_call.1
= control target key start
LH: loop header
LB: loop body
LE: loop exit
PB: predicated region body
PF: predicated region fallthrough
CT: control target
= control target key end

     0   :  { %8 = vsyncpa [#allocation3], 0  ;;  %s1018_s0 = inlined_call_operand.hbm [shape: f32[16,128], index: 0, kind: input, shape index: {}]   ;;  %s1019_s1 = inlined_call_operand.hbm [shape: f32[128,128], index: 1, kind: input, shape index: {}]   ;;  %s1020_s2 = inlined_call_operand.vmem [shape: f32[1,128], index: 2, kind: input, shape index: {}]   ;;  %s1021_s3 = inlined_call_operand.hbm [shape: f32[16,128], index: 3, kind: output, shape index: {}]  }
   0x1   :  { %10 = vsyncpa [#allocation3 + $0x1], 0 }
   0x2   :  { %11 = vsyncpa [#allocation6], 0 }
   0x3   :  { %12 = vsyncpa [#allocation4], 0 }
   0x4   :  { %14 = vsyncpa [#allocation4 + $0x1], 0  ;;  %s794_s12 = smov 0   ;;  %s796_s13 = smov 0  }
   0x5   :  { %s798_s14 = smov 0   ;;  %s800_s15 = smov 0  }
   0x6   :  { %s802_s16 = smov 0   ;;  %s804_s17 = smov 0  }
   0x7 LB: > { %s449_s18 = sadd.s32 4294967295, %s764_s17   ;;  %s450_s19 = sadd.s32 4294967294, %s764_s17   ;;  %s764_s17 = sphi %s804_s17, %s20_s17   ;;  %s760_s16 = sphi %s802_s16, %s1045_s16   ;;  %s756_s15 = sphi %s800_s15, %s1044_s15   ;;  %s752_s14 = sphi %s798_s14, %s1043_s14   ;;  %s748_s13 = sphi %s796_s13, %s1042_s13   ;;  %s744_s12 = sphi %s794_s12, %s1041_s12  }
   0x8   : > { %p52_p0 = scmp.ne.s32.totalorder %s748_s13, %s744_s12  ;;  %p828_p1 = scmp.eq.s32.totalorder %s449_s18, 0 }
   0x9   : > { %p832_p2 = scmp.eq.s32.totalorder %s449_s18, 1  ;;  %p136_p3 = scmp.eq.s32.totalorder %s450_s19, 1 }
   0xa   : > { %s1026_s20 = scalar_select %p828_p1, 1, 0 }
   0xb   : > { %s1027_s21 = scalar_select %p832_p2, 1, 0 }
   0xc   : > { %p838_p4 = por %p828_p1, %p52_p0  ;;  %p451_p5 = scmp.ge.s32.totalorder %s764_s17, 1 }
   0xd   : > { %p843_p6 = por %p136_p3, %p52_p0  ;;  %p143_p7 = scmp.lt.s32.totalorder %s764_s17, 3 }
   0xe   : > { %s1028_s22 = scalar_select %p838_p4, 1, 0 }
   0xf   : > { %s1029_s23 = scalar_select %p843_p6, 1, 0 }
  0x10   : > { %p848_p8 = pnand %p451_p5, %p143_p7  ;;  %s766_s25 = smov [#allocation5]  }
  0x11   : > { %s157_s26 = sshll.u32 %s766_s25, 4  ;;  %s32_s28 = sadd.s32 1, %s760_s16  ;;  %s158_s26 = int_to_ptr.vmem [resolvable:$true] %s157_s26 }
  0x12   : > { %s1030_s24 = scalar_select %p848_p8, 1, 0 }
  0x13   : > { %p550_p9 = pneg %p848_p8  ;;  %s620_s4 = scalar_lea.hbm %s1019_s1, 2048 }
  0x14   : > { %p621_p12 = scmp.ne.s32.totalorder %s1019_s1, %s620_s4  ;;  %p627_p5 = scmp.lt.u32.totalorder %s620_s4, %s1019_s1 }
  0x15   : > { %p857_p11 = pnand %p550_p9, %p828_p1 }
  0x17   : > { %p622_p13 = pneg %p857_p11 }
  0x19   : > { %p623_p0 = pnand %p622_p13, %p621_p12 }
  0x1b   : > { %p624_p3 = pneg %p623_p0 }
  0x1d   : > { %p629_p7 = pnand %p627_p5, %p624_p3 }
  0x1f   : > { %632 = shalt.err (!%p629_p7)
}
  0x20   : > { %s633_s9 = scalar_lea.vmem %s158_s26, 2048  ;;  %p641_p1 = scmp.lt.s32.totalorder %s158_s26, %s158_s26 }
  0x21   : > { %p634_p9 = scmp.ne.s32.totalorder %s158_s26, %s633_s9  ;;  %p642_p4 = scmp.lt.s32.totalorder %s633_s9, %s633_s9 }
  0x23   : > { %p636_p10 = pnand %p634_p9, %p622_p13  ;;  %p643_p8 = por %p642_p4, %p641_p1 }
  0x25   : > { %p637_p6 = pneg %p636_p10 }
  0x27   : > { %p644_p2 = pnand %p643_p8, %p637_p6 }
  0x29   : > { %647 = shalt.err (!%p644_p2)
}
  0x2a   : > { %s767_s10 = smov 128   ;;  %s768_s11 = smov 8  }
  0x2b   : > { %553 = dma.hbm_to_vmem [thread:$0]  (!%p857_p11), %s1019_s1, 2048, %s158_s26, [#allocation6], %s767_s10, %s767_s10, %s768_s11  }
  0x2c   : > { %p34_p1 = scmp.ge.s32.totalorder %s32_s28, 2  ;;  %s39_s25 = sadd.s32 1, %s752_s14 }
  0x2d   : > { %p46_p2 = scmp.ne.s32.totalorder %s752_s14, %s748_s13  ;;  %p47_p4 = scmp.eq.s32.totalorder %s764_s17, 0 }
  0x2e   : > { %s1047_s28 = smov (%p34_p1, %s32_s28), 0  ;;  %p1033_p8 = scmp.ne.s32.totalorder %s1027_s21, 0 }
  0x2f   : > { %p884_p6 = por %p47_p4, %p46_p2  ;;  %s36_s27 = ssub.s32 %s760_s16, %s1047_s28 }
  0x30   : > { %p890_p10 = por %p1033_p8, %p46_p2  ;;  %p563_p12 = scmp.lt.s32.totalorder %s764_s17, 2 }
  0x31   : > { %p37_p11 = scmp.eq.s32.totalorder %s36_s27, 0  ;;  %s177_s26 = sand.u32 1, %s752_s14  }
  0x32   : > { %s455_s4 = sshll.u32 %s177_s26, 3  ;;  %s456_s6 = sshll.u32 %s760_s16, 7 }
  0x33   : > { %s899_s5 = scalar_select %p37_p11, %s752_s14, %s39_s25  }
  0x34   : > { %s905_s9 = scalar_lea.hbm %s1018_s0, %s456_s6  ;;  %s181_s21 = scalar_lea.vmem [#allocation2], %s455_s4 }
  0x35   : > { %s188_s10 = sshll.u32 %s181_s21, 4  ;;  %p911_p13 = pnand %p563_p12, %p884_p6  ;;  %s907_s10 = int_to_ptr.vmem [resolvable:$true] %s188_s10 }
  0x36   : > { %s178_s18 = scalar_lea.sflag [#allocation3], %s177_s26  ;;  %s648_s19 = scalar_lea.hbm %s905_s9, 128 }
  0x37   : > { %p649_p0 = scmp.ne.s32.totalorder %s905_s9, %s648_s19  ;;  %p650_p3 = pneg %p911_p13 }
  0x38   : > { %s653_s4 = scalar_lea.hbm %s1018_s0, 256  ;;  %p654_p9 = scmp.lt.u32.totalorder %s905_s9, %s1018_s0 }
  0x39   : > { %p651_p5 = pnand %p650_p3, %p649_p0  ;;  %p655_p1 = scmp.lt.u32.totalorder %s653_s4, %s648_s19 }
  0x3a   : > { %p657_p4 = scmp.lt.u32.totalorder %s648_s19, %s905_s9 }
  0x3b   : > { %p652_p7 = pneg %p651_p5  ;;  %p656_p2 = por %p655_p1, %p654_p9 }
  0x3d   : > { %p658_p6 = por %p657_p4, %p656_p2 }
  0x3f   : > { %p659_p8 = pnand %p658_p6, %p652_p7 }
  0x41   : > { %662 = shalt.err (!%p659_p8)
}
  0x42   : > { %s663_s26 = scalar_lea.vmem %s907_s10, 128  ;;  %s769_s7 = smov [#allocation2]  }
  0x43   : > { %p664_p12 = scmp.ne.s32.totalorder %s907_s10, %s663_s26  ;;  %s668_s8 = sshll.u32 %s769_s7, 4  ;;  %s669_s8 = int_to_ptr.vmem [resolvable:$false] %s668_s8 }
  0x44   : > { %s670_s21 = scalar_lea.vmem %s669_s8, 256  ;;  %p671_p5 = scmp.lt.s32.totalorder %s907_s10, %s669_s8 }
  0x45   : > { %p666_p11 = pnand %p664_p12, %p650_p3  ;;  %p672_p9 = scmp.lt.s32.totalorder %s670_s21, %s663_s26 }
  0x47   : > { %p667_p0 = pneg %p666_p11  ;;  %p673_p1 = por %p672_p9, %p671_p5 }
  0x49   : > { %p674_p2 = pnand %p673_p1, %p667_p0 }
  0x4b   : > { %677 = shalt.err (!%p674_p2)
}
  0x4c   : > { %557 = dma.hbm_to_vmem [thread:$0]  (!%p911_p13), %s905_s9, 128, %s907_s10, %s178_s18  }
  0x4d   : > { %p1036_p7 = scmp.ne.s32.totalorder %s1030_s24, 0 }
  0x4e   : > { %s943_s19 = sand.u32 (!%p1036_p7), 1, %s748_s13   ;;  %p1037_p3 = scmp.ne.s32.totalorder (!%p1036_p7), %s1028_s22, 0 }
  0x4f   : > { %197 = sbr.rel (%p1036_p7) target bundleno = 353 (0x161), region = 32  ;;  %s458_s25 = sshll.u32 (!%p1036_p7), %s943_s19, 3 }
  0x50   : > { %s200_s27 = scalar_lea.sflag (!%p1036_p7), [#allocation3], %s943_s19  ;;  %s949_s4 = scalar_lea.vmem (!%p1036_p7), [#allocation2], %s458_s25 }
  0x56   : > { %731 = dma.done.wait (%p1037_p3), %s200_s27, 128  }
  0x57   : > { %733 = vsyncadd (%p1037_p3), %s200_s27, 4294967168  ;;  %p1038_p13 = scmp.ne.s32.totalorder %s1026_s20, 0 }
  0x59   : > { %735 = dma.done.wait (%p1038_p13), [#allocation6], 2048  }
  0x5a   : > { %737 = vsyncadd (%p1038_p13), [#allocation6], 4294965248  ;;  %v770_v0 = vmov 0.0|0.0   ;;  %vm771_vm0 = vmmov 0   ;;  %v772_v1 = vmov 0.0   ;;  %v237_v2 = vld [vmem:[#allocation5] sm:$0xff] }
  0x5b   : > { %518 = vmatprep.subr.bf16.mxu0 %v770_v0  ;;  %515 = vmatprep.mubr.msk.f32.mxu0 %vm771_vm0, %v772_v1  ;;  %v238_v3 = vld [vmem:[#allocation5 + $0x8] sm:$0xff]  ;;  %v239_v4 = vld [vmem:[#allocation5 + $0x10] sm:$0xff]  ;;  %v240_v6 = vld [vmem:[#allocation5 + $0x18] sm:$0xff]  ;;  %s463_s24 = sshll.u32 %s756_s15, 7  ;;  %s232_s9 = scalar_lea.vmem [#allocation7], %s458_s25 }
  0x5c   : > { %v519_v5 = vpack.c.bf16 %v238_v3, %v237_v2  ;;  %v522_v7 = vpack.c.bf16 %v240_v6, %v239_v4  ;;  %v241_v8 = vld [vmem:[#allocation5 + $0x20] sm:$0xff]  ;;  %v242_v9 = vld [vmem:[#allocation5 + $0x28] sm:$0xff]  ;;  %v243_v11 = vld [vmem:[#allocation5 + $0x30] sm:$0xff]  ;;  %s346_s10 = sshll.u32 %s232_s9, 4  ;;  %s969_s29 = scalar_lea.hbm %s1021_s3, %s463_s24  ;;  %s971_s10 = int_to_ptr.vmem [resolvable:$true] %s346_s10 }
  0x5d   : > { %v525_v10 = vpack.c.bf16 %v242_v9, %v241_v8  ;;  %v244_v12 = vld [vmem:[#allocation5 + $0x38] sm:$0xff]  ;;  %v245_v14 = vld [vmem:[#allocation5 + $0x40] sm:$0xff]  ;;  %v246_v15 = vld [vmem:[#allocation5 + $0x48] sm:$0xff]  ;;  %s332_s6 = scalar_lea.sflag [#allocation4], %s943_s19  ;;  %s678_s26 = scalar_lea.vmem %s971_s10, 128 }
  0x5e   : > { %520 = vmatpush3.bf16.msra.mxu0 %v519_v5  ;;  %v528_v13 = vpack.c.bf16 %v244_v12, %v243_v11  ;;  %v531_v16 = vpack.c.bf16 %v246_v15, %v245_v14  ;;  %v247_v17 = vld [vmem:[#allocation5 + $0x50] sm:$0xff]  ;;  %v248_v18 = vld [vmem:[#allocation5 + $0x58] sm:$0xff]  ;;  %v249_v20 = vld [vmem:[#allocation5 + $0x60] sm:$0xff]  ;;  %p679_p4 = scmp.ne.s32.totalorder %s971_s10, %s678_s26  ;;  %s773_s15 = smov [#allocation7]  }
  0x5f   : > { %521 = vmatprep.subr.bf16.mxu0 %v770_v0  ;;  %v534_v19 = vpack.c.bf16 %v248_v18, %v247_v17  ;;  %v250_v21 = vld [vmem:[#allocation5 + $0x68] sm:$0xff]  ;;  %v251_v23 = vld [vmem:[#allocation5 + $0x70] sm:$0xff]  ;;  %v252_v24 = vld [vmem:[#allocation5 + $0x78] sm:$0xff]  ;;  %s682_s7 = sshll.u32 %s773_s15, 4  ;;  %s683_s7 = int_to_ptr.vmem [resolvable:$false] %s682_s7 }
  0x60   : > { %v537_v22 = vpack.c.bf16 %v250_v21, %v249_v20  ;;  %v540_v25 = vpack.c.bf16 %v252_v24, %v251_v23  ;;  %v236_v26 = vld [vmem:[%s949_s4] sm:$0xff]  ;;  %p680_p6 = pnand %p679_p4, %p890_p10  ;;  %s684_s8 = scalar_lea.vmem %s683_s7, 256 }
  0x61   : > { %v461_v27 = vld [vmem:[%s1020_s2] ss:$0 sm:$0xff]  ;;  %p685_p12 = scmp.lt.s32.totalorder %s971_s10, %s683_s7  ;;  %p686_p11 = scmp.lt.s32.totalorder %s684_s8, %s678_s26 }
  0x62   : > { %523 = vmatpush3.bf16.msra.mxu0 %v522_v7  ;;  %p681_p8 = pneg %p680_p6 }
  0x63   : > { %524 = vmatprep.subr.bf16.mxu0 %v770_v0  ;;  %p687_p0 = por %p686_p11, %p685_p12 }
  0x65   : > { %p688_p5 = pnand %p687_p0, %p681_p8 }
  0x66   : > { %526 = vmatpush3.bf16.msra.mxu0 %v525_v10 }
  0x67   : > { %527 = vmatprep.subr.bf16.mxu0 %v770_v0 }
  0x6a   : > { %529 = vmatpush3.bf16.msra.mxu0 %v528_v13 }
  0x6b   : > { %530 = vmatprep.subr.bf16.mxu0 %v770_v0 }
  0x6e   : > { %532 = vmatpush3.bf16.msra.mxu0 %v531_v16 }
  0x6f   : > { %533 = vmatprep.subr.bf16.mxu0 %v770_v0 }
  0x72   : > { %535 = vmatpush3.bf16.msra.mxu0 %v534_v19 }
  0x73   : > { %536 = vmatprep.subr.bf16.mxu0 %v770_v0 }
  0x76   : > { %538 = vmatpush3.bf16.msra.mxu0 %v537_v22 }
  0x77   : > { %539 = vmatprep.subr.bf16.mxu0 %v770_v0 }
  0x7a   : > { %541 = vmatpush3.bf16.msra.mxu0 %v540_v25 }
  0x7d   : > { %516 = vmatmul.mubr.f32.vlgmr.msra.gmra.mrb[0].mxu0 %v236_v26 }
 0x150   : > { %v326_v28 = vpop.f32.mrb[0].mxu0 }
 0x151   : > { %v327_v29 = vadd.f32 %v461_v27, %v326_v28  ;;  %v517_v30 = vpop.f32.mrb[1].mxu0 }
 0x153   : > { %330 = vst [vmem:[%s232_s9] sm:$0xff] %v327_v29 }
 0x154   : > { %691 = shalt.err (!%p688_p5)
}
 0x155   : > { %s692_s21 = scalar_lea.hbm %s969_s29, 128  ;;  %s696_s27 = scalar_lea.hbm %s1021_s3, 256 }
 0x156   : > { %p693_p9 = scmp.ne.s32.totalorder %s969_s29, %s692_s21  ;;  %p697_p7 = scmp.lt.u32.totalorder %s969_s29, %s1021_s3 }
 0x157   : > { %p698_p3 = scmp.lt.u32.totalorder %s696_s27, %s692_s21  ;;  %p700_p4 = scmp.lt.u32.totalorder %s692_s21, %s969_s29 }
 0x158   : > { %p694_p1 = pnand %p693_p9, %p890_p10 }
 0x159   : > { %p699_p13 = por %p698_p3, %p697_p7 }
 0x15a   : > { %p695_p2 = pneg %p694_p1 }
 0x15b   : > { %p701_p6 = por %p700_p4, %p699_p13 }
 0x15d   : > { %p702_p8 = pnand %p701_p6, %p695_p2 }
 0x15f   : > { %705 = shalt.err (!%p702_p8)
}
 0x160   : > { %548 = dma.vmem_to_hbm [thread:$0]  (%p890_p10), %s971_s10, 128, %s969_s29, %s332_s6  }
 0x161 PF: > { %s358_s22 = sand.u32 1, %s744_s12   ;;  %p1039_p12 = scmp.ne.s32.totalorder %s1029_s23, 0 }
 0x162   : > { %p1040_p11 = scmp.ge.s32.totalorder %s764_s17, 2  ;;  %s359_s24 = scalar_lea.sflag [#allocation4], %s358_s22 }
 0x164   : > { %p559_p0 = pnand %p1040_p11, %p1039_p12 }
 0x166   : > { %739 = dma.done.wait (!%p559_p0), %s359_s24, 128  }
 0x167   : > { %741 = vsyncadd (!%p559_p0), %s359_s24, 4294967168  ;;  %s20_s17 = sadd.s32 1, %s764_s17   ;;  %s1041_s12 = smov %s748_s13 }
 0x168   : > { %p17_p5 = scmp.ge.s32.totalorder %s20_s17, 4   ;;  %s1042_s13 = smov %s752_s14 }
 0x169   : > { %s1043_s14 = smov %s899_s5  ;;  %s1044_s15 = smov %s760_s16 }
 0x16a   : > { %s1045_s16 = smov %s1047_s28  ;;  %19 = sbr.rel (!%p17_p5) target bundleno = 7 (0x7), region = 85 }
 0x171   :  { %364 = vsyncpa [#allocation3], 1 }
 0x172   :  { %366 = vsyncpa [#allocation3 + $0x1], 1 }
 0x173   :  { %367 = vsyncpa [#allocation6], 1 }
 0x174   :  { %368 = vsyncpa [#allocation4], 1 }
 0x175   :  { %370 = vsyncpa [#allocation4 + $0x1], 1 }

</bundles_post_ra>
